<compile_context>
chip_gen: v7x
topology: tpu7x:2x2x1
jax: 0.10.0
libtpu: 0.0.40
codegen_flags: <defaults>
</compile_context>

<pallas_src>
import functools
import math

import jax
import jax.numpy as jnp
from jax import lax
from jax.experimental import pallas as pl
from jax.experimental.pallas import tpu as pltpu

_VMEM_LIMIT = 64 * 1024 * 1024


def _round_up(x, m):
    return (x + m - 1) // m * m


def _attn_tile_default():
    # v5e MXU is 4x128x128 -> 128 tiles already saturate it; v6e/v7x MXU is 2x256x256 -> 256.
    try:
        kind = jax.devices()[0].device_kind.lower()
    except Exception:
        kind = ""
    return 128 if "v5" in kind else 256


def _head_group_width(n_heads, d_k, max_width=512):
    """Width (in elements) of the head group processed per attention grid step.

    Keeps the lane axis of q/k/v blocks, the output and the accumulator >= 128 wide whenever
    possible, capped at max_width to bound VMEM (v7x has only 64 MiB physical VMEM).
    """
    d_model = n_heads * d_k
    if d_model <= max_width:
        return d_model
    for g in range(n_heads, 0, -1):
        w = g * d_k
        if w <= max_width and n_heads % g == 0 and w % 128 == 0:
            return w
    return d_model


# -----------------------------------------------------------------------------
# Linear: y = x @ W + b   (W stored as (in_features, out_features))
# -----------------------------------------------------------------------------
def _linear_kernel(x_ref, w_ref, b_ref, o_ref):
    acc = jnp.dot(x_ref[...], w_ref[...], preferred_element_type=jnp.float32)
    o_ref[...] = (acc + b_ref[...]).astype(o_ref.dtype)


def linear_pallas(x2d, w, b, *, tm=512, tn=512):
    """x2d: (M, d_in), w: (d_in, d_out), b: (d_out,) -> (M, d_out)."""
    M, d_in = x2d.shape
    d_out = w.shape[1]

    tm = min(tm, _round_up(M, 8))
    m_pad = _round_up(M, tm)
    if m_pad != M:
        x2d = jnp.pad(x2d, ((0, m_pad - M), (0, 0)))

    # Tile d_out so the weight block stays VMEM-bounded (v7x); fall back to a single
    # full-width tile for small / non-128-aligned d_out.
    if d_out % tn != 0:
        tn = next((t for t in (256, 128) if d_out % t == 0), d_out)
    tn = min(tn, d_out)

    b2d = b.reshape(1, d_out)
    itemsize = x2d.dtype.itemsize
    cost = pl.CostEstimate(
        flops=2 * m_pad * d_in * d_out,
        transcendentals=0,
        bytes_accessed=(m_pad * d_in + d_in * d_out + d_out + m_pad * d_out) * itemsize,
    )

    # n outer / m inner: the weight tile stays resident (no re-DMA) across the inner m loop.
    # TODO(synk): pipeline_mode=pl.Buffered(1) on the weight/bias specs would halve their
    #             VMEM footprint on v7x; left at the default double-buffering for safety.
    grid = (d_out // tn, m_pad // tm)
    out = pl.pallas_call(
        _linear_kernel,
        out_shape=jax.ShapeDtypeStruct((m_pad, d_out), x2d.dtype),
        grid_spec=pltpu.PrefetchScalarGridSpec(
            num_scalar_prefetch=0,
            grid=grid,
            in_specs=[
                pl.BlockSpec((tm, d_in), lambda j, i: (i, 0)),   # activation rows
                pl.BlockSpec((d_in, tn), lambda j, i: (0, j)),   # weight column tile
                pl.BlockSpec((1, tn), lambda j, i: (0, j)),      # bias tile
            ],
            out_specs=pl.BlockSpec((tm, tn), lambda j, i: (i, j)),
        ),
        compiler_params=pltpu.CompilerParams(
            dimension_semantics=("parallel", "parallel"),
            vmem_limit_bytes=_VMEM_LIMIT,
        ),
        cost_estimate=cost,
    )(x2d, w, b2d)
    return out[:M]


# -----------------------------------------------------------------------------
# Flash-attention core (online softmax), heads packed on the lane axis.
# grid = (batch, head_groups, q_tiles, kv_tiles)
# -----------------------------------------------------------------------------
def _flash_attn_kernel(*refs, d_k, g_heads, has_mask):
    if has_mask:
        q_ref, k_ref, v_ref, mask_ref, o_ref, m_sc, l_sc, acc_sc = refs
    else:
        q_ref, k_ref, v_ref, o_ref, m_sc, l_sc, acc_sc = refs

    kv = pl.program_id(3)

    @pl.when(kv == 0)
    def _():
        m_sc[...] = jnp.full_like(m_sc, -jnp.inf)
        l_sc[...] = jnp.zeros_like(l_sc)
        acc_sc[...] = jnp.zeros_like(acc_sc)

    q = q_ref[...]                        # (tq, g_heads*d_k); 1/sqrt(d_k) already folded into Wq
    k = k_ref[...]                        # (tk, g_heads*d_k)
    v = v_ref[...]                        # (tk, g_heads*d_k)
    if has_mask:
        blocked = mask_ref[...] == 0      # (tq, tk); reference: scores[mask == 0] = -1e9

    m_prev = m_sc[...]                    # (tq, g_heads)
    l_prev = l_sc[...]
    acc_prev = acc_sc[...]

    m_cols, l_cols, alpha_cols, ctx_cols = [], [], [], []
    for h in range(g_heads):              # static unroll over heads in the group
        lo = h * d_k
        s = lax.dot_general(q[:, lo:lo + d_k], k[:, lo:lo + d_k],
                            (((1,), (1,)), ((), ())),
                            preferred_element_type=jnp.float32)          # (tq, tk)
        if has_mask:
            s = jnp.where(blocked, jnp.float32(-1e9), s)
        m_p = m_prev[:, h:h + 1]
        m_n = jnp.maximum(m_p, s.max(axis=-1, keepdims=True))
        alpha = jnp.exp(m_p - m_n)
        p = jnp.exp(s - m_n)
        ctx = jnp.dot(p.astype(v.dtype), v[:, lo:lo + d_k],
                      preferred_element_type=jnp.float32)                # (tq, d_k)
        m_cols.append(m_n)
        l_cols.append(alpha * l_prev[:, h:h + 1] + p.sum(axis=-1, keepdims=True))
        alpha_cols.append(jnp.broadcast_to(alpha, (alpha.shape[0], d_k)))
        ctx_cols.append(ctx)

    # Full-width read-modify-write of all scratch state (lane-dense stores).
    m_sc[...] = jnp.concatenate(m_cols, axis=1)
    l_sc[...] = jnp.concatenate(l_cols, axis=1)
    acc_sc[...] = (jnp.concatenate(alpha_cols, axis=1) * acc_prev
                   + jnp.concatenate(ctx_cols, axis=1))

    @pl.when(kv == pl.num_programs(3) - 1)
    def _():
        l = l_sc[...]
        inv = jnp.concatenate(
            [jnp.broadcast_to(1.0 / l[:, h:h + 1], (l.shape[0], d_k)) for h in range(g_heads)],
            axis=1)
        # Single full-width (unmasked) store of the normalized group output.
        o_ref[...] = (acc_sc[...] * inv).astype(o_ref.dtype)


def flash_attention_pallas(q_arr, k_arr, v_arr, mask=None, *, d_model, n_heads,
                           col_offsets=(0, 0, 0), group_width=None, tq=None, tk=None):
    """Attention over the (B, S, H*d_k) "heads packed on the lane axis" layout.

    q_arr: (B, Sq, Dq); k_arr/v_arr: (B, Skv, Dk).  Arrays may be wider than d_model (e.g.
    the fused QKV projection output); `col_offsets` gives (in units of group_width) where the
    q / k / v columns start inside each array.  mask: (B, Sq, Skv), 0 == blocked, or None.
    Returns (B, Sq, d_model).
    """
    B, sq, _ = q_arr.shape
    skv = k_arr.shape[1]
    d_k = d_model // n_heads

    gd = group_width if group_width is not None else _head_group_width(n_heads, d_k)
    assert d_model % gd == 0 and gd % d_k == 0
    g_heads = gd // d_k
    n_groups = d_model // gd

    tile = _attn_tile_default()
    tq = min(tq or tile, sq)
    tk = min(tk or tile, skv)
    # TODO(synk): arbitrary sequence lengths would need tail padding here.
    assert sq % tq == 0 and skv % tk == 0, "sequence lengths must tile evenly"

    has_mask = mask is not None
    kernel = functools.partial(_flash_attn_kernel, d_k=d_k, g_heads=g_heads, has_mask=has_mask)

    qo, ko, vo = col_offsets
    in_specs = [
        pl.BlockSpec((None, tq, gd), lambda b, g, qi, ki: (b, qi, g + qo)),
        pl.BlockSpec((None, tk, gd), lambda b, g, qi, ki: (b, ki, g + ko)),
        pl.BlockSpec((None, tk, gd), lambda b, g, qi, ki: (b, ki, g + vo)),
    ]
    args = [q_arr, k_arr, v_arr]
    if has_mask:
        # int8 mask: 4x less HBM traffic than int32, fetched once per head-group (not per head).
        in_specs.append(pl.BlockSpec((None, tq, tk), lambda b, g, qi, ki: (b, qi, ki)))
        args.append(mask.astype(jnp.int8))

    itemsize = q_arr.dtype.itemsize
    cost = pl.CostEstimate(
        flops=4 * B * n_heads * sq * skv * d_k,
        transcendentals=B * n_heads * sq * skv,
        bytes_accessed=(B * (2 * sq + 2 * skv) * d_model) * itemsize
        + (B * sq * skv if has_mask else 0),
    )

    return pl.pallas_call(
        kernel,
        out_shape=jax.ShapeDtypeStruct((B, sq, d_model), q_arr.dtype),
        grid_spec=pltpu.PrefetchScalarGridSpec(
            num_scalar_prefetch=0,
            grid=(B, n_groups, sq // tq, skv // tk),
            in_specs=in_specs,
            out_specs=pl.BlockSpec((None, tq, gd), lambda b, g, qi, ki: (b, qi, g)),
            scratch_shapes=[
                pltpu.VMEM((tq, g_heads), jnp.float32),   # running max per head
                pltpu.VMEM((tq, g_heads), jnp.float32),   # running denominator per head
                pltpu.VMEM((tq, gd), jnp.float32),        # lane-dense output accumulator
            ],
        ),
        compiler_params=pltpu.CompilerParams(
            dimension_semantics=("parallel", "parallel", "parallel", "arbitrary"),
            vmem_limit_bytes=_VMEM_LIMIT,
        ),
        cost_estimate=cost,
    )(*args)


# -----------------------------------------------------------------------------
# Full module forward
# -----------------------------------------------------------------------------
def multiheaded_attention(query, key, value, params, *, n_heads, mask=None):
    """query: (B, Sq, D); key/value: (B, Skv, D); mask: (B, Sq, Skv) or None."""
    wq, bq, wk, bk, wv, bv, wo, bo = params
    B, Sq, D = query.shape
    assert D % n_heads == 0
    d_k = D // n_heads
    scale = 1.0 / math.sqrt(d_k)

    # Fold 1/sqrt(d_k) into the q projection (removes a (tq, tk) VPU multiply per kv step).
    wq_s, bq_s = wq * scale, bq * scale
    gd = _head_group_width(n_heads, d_k)

    if (query is key) and (key is value):
        # Self-attention: fused QKV projection -- activation rows read from HBM once,
        # one launch, lane-dense (M, 3D) output tile.
        w_qkv = jnp.concatenate([wq_s, wk, wv], axis=1)
        b_qkv = jnp.concatenate([bq_s, bk, bv], axis=0)
        qkv = linear_pallas(query.reshape(B * Sq, D), w_qkv, b_qkv).reshape(B, Sq, 3 * D)
        if gd % 128 == 0:
            # Attention reads q/k/v straight out of the fused array via last-axis block
            # offsets: no slicing copy, no head-split transpose.
            q_arr = k_arr = v_arr = qkv
            offs = (0, D // gd, 2 * D // gd)
        else:
            # Small / non-128-aligned d_model: one cheap contiguous slice each (no transposes).
            q_arr, k_arr, v_arr = qkv[..., :D], qkv[..., D:2 * D], qkv[..., 2 * D:]
            offs = (0, 0, 0)
    else:
        Skv = key.shape[1]
        q_arr = linear_pallas(query.reshape(B * Sq, D), wq_s, bq_s).reshape(B, Sq, D)
        k_arr = linear_pallas(key.reshape(B * Skv, D), wk, bk).reshape(B, Skv, D)
        v_arr = linear_pallas(value.reshape(B * Skv, D), wv, bv).reshape(B, Skv, D)
        offs = (0, 0, 0)

    # Dropout(p=0.25) on attention probs: identity (eval mode) -- see TODO at top of file.
    ctx = flash_attention_pallas(q_arr, k_arr, v_arr, mask, d_model=D, n_heads=n_heads,
                                 col_offsets=offs, group_width=gd)

    # ctx is already in (B, Sq, H*d_k) layout -- no head-merge transpose needed.
    out = linear_pallas(ctx.reshape(B * Sq, D), wo, bo)
    return out.reshape(B, Sq, D)


# -----------------------------------------------------------------------------
# Pure-JAX reference
# -----------------------------------------------------------------------------
def mha_reference(query, key, value, params, *, n_heads, mask=None):
    wq, bq, wk, bk, wv, bv, wo, bo = params
    B, Sq, D = query.shape
    d_k = D // n_heads
    hp = lax.Precision.HIGHEST

    def proj(x, w, b):
        return (jnp.dot(x, w, precision=hp) + b).reshape(
            B, -1, n_heads, d_k).transpose(0, 2, 1, 3)

    q = proj(query, wq, bq)
    k = proj(key, wk, bk)
    v = proj(value, wv, bv)
    scores = jnp.einsum("bhqd,bhkd->bhqk", q, k, precision=hp) / math.sqrt(d_k)
    if mask is not None:
        scores = jnp.where(mask[:, None, :, :] == 0, -1e9, scores)
    probs = jax.nn.softmax(scores, axis=-1)
    ctx = jnp.einsum("bhqk,bhkd->bhqd", probs, v, precision=hp)
    ctx = ctx.transpose(0, 2, 1, 3).reshape(B, Sq, D)
    return jnp.dot(ctx, wo, precision=hp) + bo


if __name__ == "__main__":
    # Full-precision f32 matmuls so kernel vs. reference stays tight; production use would
    # pass bf16 activations/weights (MXU-native) with unchanged f32 accumulation.
    jax.config.update("jax_default_matmul_precision", "highest")

    def make_params(key, d_model):
        bound = 1.0 / math.sqrt(d_model)
        ks = jax.random.split(key, 8)

        def lin(kw, kb):
            w = jax.random.uniform(kw, (d_model, d_model), jnp.float32, -bound, bound)
            b = jax.random.uniform(kb, (d_model,), jnp.float32, -bound, bound)
            return w, b

        wq, bq = lin(ks[0], ks[1])
        wk, bk = lin(ks[2], ks[3])
        wv, bv = lin(ks[4], ks[5])
        wo, bo = lin(ks[6], ks[7])
        return (wq, bq, wk, bk, wv, bv, wo, bo)

    def check(out, ref, tag):
        out = jax.block_until_ready(out)
        err = float(jnp.max(jnp.abs(out - ref)))
        assert jnp.allclose(out, ref, atol=2e-3, rtol=2e-3), (tag, err)

    root = jax.random.PRNGKey(0)
    k_small, k_cross, k_med, k_p_small, k_p_med = jax.random.split(root, 5)

    # --- small self-attention (B=2, S=8, d_model=32, heads=4): fused QKV, sliced path ---
    B, S, D, H = 2, 8, 32, 4
    params_s = make_params(k_p_small, D)
    x = jax.random.normal(k_small, (B, S, D), jnp.float32)

    out = multiheaded_attention(x, x, x, params_s, n_heads=H)
    check(out, mha_reference(x, x, x, params_s, n_heads=H), "self/unmasked")

    causal = jnp.broadcast_to(jnp.tril(jnp.ones((S, S), jnp.int32)), (B, S, S))
    out = multiheaded_attention(x, x, x, params_s, n_heads=H, mask=causal)
    check(out, mha_reference(x, x, x, params_s, n_heads=H, mask=causal), "self/causal")

    # --- small cross-attention (distinct q/k/v tensors): separate-projection path ---
    kq, kk, kv_ = jax.random.split(k_cross, 3)
    q_in = jax.random.normal(kq, (B, S, D), jnp.float32)
    k_in = jax.random.normal(kk, (B, S, D), jnp.float32)
    v_in = jax.random.normal(kv_, (B, S, D), jnp.float32)
    out = multiheaded_attention(q_in, k_in, v_in, params_s, n_heads=H)
    check(out, mha_reference(q_in, k_in, v_in, params_s, n_heads=H), "cross/unmasked")

    # --- medium self-attention (B=2, S=128, d_model=256, heads=4, d_k=64): lane-dense
    #     head packing + direct reads from the fused (B, S, 3D) projection output ---
    Bm, Sm, Dm, Hm = 2, 128, 256, 4
    params_m = make_params(k_p_med, Dm)
    xm = jax.random.normal(k_med, (Bm, Sm, Dm), jnp.float32)
    causal_m = jnp.broadcast_to(jnp.tril(jnp.ones((Sm, Sm), jnp.int32)), (Bm, Sm, Sm))
    out = multiheaded_attention(xm, xm, xm, params_m, n_heads=Hm, mask=causal_m)
    check(out, mha_reference(xm, xm, xm, params_m, n_heads=Hm, mask=causal_m), "medium/causal")

    print("KERNEL_OK")
</pallas_src>

<mosaic_0001>
module attributes {stable_mosaic.version = 11 : i64} {
  func.func @_linear_kernel(%arg0: i32, %arg1: i32, %arg2: memref<16x32xf32, #tpu.memory_space<vmem>>, %arg3: memref<32x96xf32, #tpu.memory_space<vmem>>, %arg4: memref<1x96xf32, #tpu.memory_space<vmem>>, %arg5: memref<16x96xf32, #tpu.memory_space<vmem>>) attributes {dimension_semantics = [#tpu.dimension_semantics<parallel>, #tpu.dimension_semantics<parallel>], iteration_bounds = array<i64: 1, 1>, scalar_prefetch = 0 : i64, scratch_operands = 0 : i64, tpu.core_type = #tpu.core_type<tc>, window_params = [{transform_indices = @transform_0, window_bounds = array<i64: 16, 32>}, {transform_indices = @transform_1, window_bounds = array<i64: 32, 96>}, {transform_indices = @transform_2, window_bounds = array<i64: 1, 96>}, {transform_indices = @transform_3, window_bounds = array<i64: 16, 96>}]} {
    %c0 = arith.constant 0 : index
    %c0_0 = arith.constant 0 : index
    %0 = vector.load %arg2[%c0, %c0_0] : memref<16x32xf32, #tpu.memory_space<vmem>>, vector<16x32xf32>
    %c0_1 = arith.constant 0 : index
    %c0_2 = arith.constant 0 : index
    %1 = vector.load %arg3[%c0_1, %c0_2] : memref<32x96xf32, #tpu.memory_space<vmem>>, vector<32x96xf32>
    %cst = arith.constant dense<0.000000e+00> : vector<16x96xf32>
    %2 = tpu.matmul %0, %1, %cst {dimension_numbers = #tpu.dot_dimension_numbers<[1], [0], [0], [1], [0, 0, 1, 1], [], []>, precision = #tpu.contract_precision<fp32>} : vector<16x32xf32>, vector<32x96xf32>, vector<16x96xf32> -> vector<16x96xf32>
    %c0_3 = arith.constant 0 : index
    %c0_4 = arith.constant 0 : index
    %3 = vector.load %arg4[%c0_3, %c0_4] : memref<1x96xf32, #tpu.memory_space<vmem>>, vector<1x96xf32>
    %4 = vector.broadcast %3 : vector<1x96xf32> to vector<16x96xf32>
    %5 = arith.addf %2, %4 : vector<16x96xf32>
    %c0_5 = arith.constant 0 : index
    %c0_6 = arith.constant 0 : index
    %6 = vector.load %arg5[%c0_5, %c0_6] : memref<16x96xf32, #tpu.memory_space<vmem>>, vector<16x96xf32>
    tpu.vector_store %arg5[%c0_5, %c0_6], %5 {strides = array<i32>} : memref<16x96xf32, #tpu.memory_space<vmem>>, vector<16x96xf32>,
    return
  }
  func.func @transform_0(%arg0: i32, %arg1: i32) -> (i32, i32) {
    %c0_i32 = arith.constant 0 : i32
    %c0_i32_0 = arith.constant 0 : i32
    return %arg1, %c0_i32 : i32, i32
  }
  func.func @transform_1(%arg0: i32, %arg1: i32) -> (i32, i32) {
    %c0_i32 = arith.constant 0 : i32
    %c0_i32_0 = arith.constant 0 : i32
    return %c0_i32, %arg0 : i32, i32
  }
  func.func @transform_2(%arg0: i32, %arg1: i32) -> (i32, i32) {
    %c0_i32 = arith.constant 0 : i32
    %c0_i32_0 = arith.constant 0 : i32
    return %c0_i32, %arg0 : i32, i32
  }
  func.func @transform_3(%arg0: i32, %arg1: i32) -> (i32, i32) {
    %c0_i32 = arith.constant 0 : i32
    return %arg1, %arg0 : i32, i32
  }
}

</mosaic_0001>

<bundles_post_ra>
// kernel: tpu_custom_call.1
= control target key start
LH: loop header
LB: loop body
LE: loop exit
PB: predicated region body
PF: predicated region fallthrough
CT: control target
= control target key end

     0   :  { %8 = vsyncpa [#allocation3], 0  ;;  %s988_s0 = inlined_call_operand.hbm [shape: f32[16,32], index: 0, kind: input, shape index: {}]   ;;  %s989_s1 = inlined_call_operand.hbm [shape: f32[32,96], index: 1, kind: input, shape index: {}]   ;;  %s990_s2 = inlined_call_operand.hbm [shape: f32[1,96], index: 2, kind: input, shape index: {}]   ;;  %s991_s3 = inlined_call_operand.hbm [shape: f32[16,96], index: 3, kind: output, shape index: {}]  }
   0x1   :  { %9 = vsyncpa [#allocation6], 0 }
   0x2   :  { %10 = vsyncpa [#allocation4], 0  ;;  %s886_s12 = smov [#allocation5]   ;;  %s887_s14 = smov [#allocation2]  }
   0x3   :  { %s28_s13 = sshll.u32 %s886_s12, 4  ;;  %s16_s15 = sshll.u32 %s887_s14, 4  ;;  %s29_s13 = int_to_ptr.vmem [resolvable:$true] %s28_s13  ;;  %s912_s15 = int_to_ptr.vmem [resolvable:$true] %s16_s15 }
   0x4   :  { %s792_s18 = scalar_lea.hbm %s989_s1, 512 }
   0x5   :  { %p793_p0 = scmp.ne.s32.totalorder %s989_s1, %s792_s18  ;;  %p796_p1 = scmp.lt.u32.totalorder %s792_s18, %s989_s1 }
   0x7   :  { %p798_p2 = pnand %p796_p1, %p793_p0 }
   0x9   :  { %801 = shalt.err (!%p798_p2)
}
   0xa   :  { %s802_s23 = scalar_lea.vmem %s29_s13, 512  ;;  %p807_p4 = scmp.lt.s32.totalorder %s29_s13, %s29_s13 }
   0xb   :  { %p803_p3 = scmp.ne.s32.totalorder %s29_s13, %s802_s23  ;;  %p808_p5 = scmp.lt.s32.totalorder %s802_s23, %s802_s23 }
   0xd   :  { %p809_p6 = por %p808_p5, %p807_p4 }
   0xf   :  { %p810_p7 = pnand %p809_p6, %p803_p3 }
  0x11   :  { %813 = shalt.err (!%p810_p7)
}
  0x12   :  { %s888_s24 = smov 128   ;;  %s889_s25 = smov 8  }
  0x13   :  { %34 = dma.hbm_to_vmem [thread:$0]  %s989_s1, 512, %s29_s13, [#allocation6], %s888_s24, %s888_s24, %s889_s25  }
  0x14   :  { %s814_s30 = scalar_lea.hbm %s988_s0, 256 }
  0x15   :  { %p815_p8 = scmp.ne.s32.totalorder %s988_s0, %s814_s30  ;;  %p818_p9 = scmp.lt.u32.totalorder %s814_s30, %s988_s0 }
  0x17   :  { %p820_p10 = pnand %p818_p9, %p815_p8 }
  0x19   :  { %823 = shalt.err (!%p820_p10)
}
  0x1a   :  { %s824_s8 = scalar_lea.vmem %s912_s15, 256  ;;  %p829_p12 = scmp.lt.s32.totalorder %s912_s15, %s912_s15 }
  0x1b   :  { %p825_p11 = scmp.ne.s32.totalorder %s912_s15, %s824_s8  ;;  %p830_p13 = scmp.lt.s32.totalorder %s824_s8, %s824_s8 }
  0x1d   :  { %p831_p0 = por %p830_p13, %p829_p12 }
  0x1f   :  { %p832_p1 = pnand %p831_p0, %p825_p11 }
  0x21   :  { %835 = shalt.err (!%p832_p1)
}
  0x22   :  { %22 = dma.hbm_to_vmem [thread:$0]  %s988_s0, 256, %s912_s15, [#allocation3], %s888_s24, %s888_s24, %s889_s25  }
  0x23   :  { %s890_s10 = smov [#allocation7]   ;;  %s836_s14 = scalar_lea.hbm %s990_s2, 16 }
  0x24   :  { %s41_s11 = sshll.u32 %s890_s10, 4  ;;  %p837_p2 = scmp.ne.s32.totalorder %s990_s2, %s836_s14  ;;  %s42_s11 = int_to_ptr.vmem [resolvable:$true] %s41_s11 }
  0x25   :  { %p840_p3 = scmp.lt.u32.totalorder %s836_s14, %s990_s2 }
  0x27   :  { %p842_p4 = pnand %p840_p3, %p837_p2 }
  0x29   :  { %845 = shalt.err (!%p842_p4)
}
  0x2a   :  { %s846_s20 = scalar_lea.vmem %s42_s11, 16  ;;  %s850_s0 = scalar_lea.vmem %s42_s11, 32 }
  0x2b   :  { %p847_p5 = scmp.ne.s32.totalorder %s42_s11, %s846_s20  ;;  %p851_p6 = scmp.lt.s32.totalorder %s42_s11, %s42_s11 }
  0x2c   :  { %p852_p7 = scmp.lt.s32.totalorder %s850_s0, %s846_s20 }
  0x2e   :  { %p853_p8 = por %p852_p7, %p851_p6 }
  0x30   :  { %p854_p9 = pnand %p853_p8, %p847_p5 }
  0x32   :  { %857 = shalt.err (!%p854_p9)
}
  0x33   :  { %44 = dma.hbm_to_vmem [thread:$0]  %s990_s2, 16, %s42_s11, [#allocation6]  }
  0x34   :  { %880 = dma.done.wait [#allocation3], 256  }
  0x35   :  { %881 = vsyncadd [#allocation3], 4294967040 }
  0x36   :  { %882 = dma.done.wait [#allocation6], 528  }
  0x37   :  { %883 = vsyncadd [#allocation6], 4294966768  ;;  %vm67_vm0 = vcmask 261120   ;;  %v56_v0 = vld [vmem:[#allocation5] sm:$0xff]  ;;  %v57_v1 = vld [vmem:[#allocation5 + $0x8] sm:$0xff]  ;;  %s891_s2 = smov [#allocation8]  }
  0x38   :  { %v58_v2 = vld [vmem:[#allocation5 + $0x10] sm:$0xff]  ;;  %v75_v3 = vand.u32 4294901760, %v56_v0  ;;  %v78_v4 = vand.u32 4294901760, %v57_v1  ;;  %v59_v5 = vld [vmem:[#allocation5 + $0x18] sm:$0xff]  ;;  %v623_v46 = vld [vmem:[#allocation7] ss:$0 sm:$0xff] }
  0x39   :  { %v81_v6 = vand.u32 4294901760, %v58_v2  ;;  %v54_v7 = vld [vmem:[#allocation2] sm:$0xff]  ;;  %v55_v8 = vld [vmem:[#allocation2 + $0x8] sm:$0xff]  ;;  %v84_v9 = vand.u32 4294901760, %v59_v5  ;;  %s610_s22 = sshll.u32 %s891_s2, 4  ;;  %vm602_vm1 = vcmask 785408   ;;  %s611_s22 = int_to_ptr.vmem [resolvable:$true] %s610_s22 }
  0x3a   :  { %v69_v10 = vsel %vm67_vm0, %v54_v7, 0  ;;  %v72_v11 = vsel %vm67_vm0, %v55_v8, 0  ;;  %v726_v12 = vpack.c.bf16 %v78_v4, %v75_v3  ;;  %v165_v15 = vsub.f32 %v56_v0, %v75_v3  ;;  %s858_s23 = scalar_lea.vmem %s611_s22, 256  ;;  %p863_p11 = scmp.lt.s32.totalorder %s611_s22, %s611_s22 }
  0x3b   :  { %v961_v13 = vand.u32 4294901760, %v69_v10  ;;  %v963_v14 = vand.u32 4294901760, %v72_v11  ;;  %v730_v16 = vpack.c.bf16 %v84_v9, %v81_v6  ;;  %v172_v17 = vsub.f32 %v57_v1, %v78_v4  ;;  %p859_p10 = scmp.ne.s32.totalorder %s611_s22, %s858_s23  ;;  %p864_p12 = scmp.lt.s32.totalorder %s858_s23, %s858_s23 }
  0x3c   :  { %v179_v18 = vsub.f32 %v58_v2, %v81_v6  ;;  %v186_v19 = vsub.f32 %v59_v5, %v84_v9  ;;  %727 = vmatprep.subr.bf16.mxu1 %v726_v12  ;;  %751 = vmatprep.subr.bf16.mxu0 %v726_v12  ;;  %v166_v22 = vand.u32 4294901760, %v165_v15 }
  0x3d   :  { %v144_v20 = vsub.f32 %v69_v10, %v961_v13  ;;  %v154_v21 = vsub.f32 %v72_v11, %v963_v14  ;;  %729 = vmatpush3.bf16.msra.mxu1 %v726_v12  ;;  %753 = vmatpush3.bf16.msra.mxu0 %v726_v12  ;;  %v173_v23 = vand.u32 4294901760, %v172_v17  ;;  %v742_v44 = vpack.c.bf16 %v172_v17, %v165_v15  ;;  %p865_p13 = por %p864_p12, %p863_p11 }
  0x3e   :  { %v180_v24 = vand.u32 4294901760, %v179_v18  ;;  %v187_v25 = vand.u32 4294901760, %v186_v19  ;;  %731 = vmatprep.subr.bf16.mxu1 %v730_v16  ;;  %755 = vmatprep.subr.bf16.mxu0 %v730_v16  ;;  %v167_v28 = vsub.f32 %v165_v15, %v166_v22  ;;  %v746_v45 = vpack.c.bf16 %v186_v19, %v179_v18 }
  0x3f   :  { %v145_v26 = vand.u32 4294901760, %v144_v20  ;;  %v155_v27 = vand.u32 4294901760, %v154_v21  ;;  %v174_v29 = vsub.f32 %v172_v17, %v173_v23  ;;  %v758_v30 = vpack.c.bf16 %v173_v23, %v166_v22  ;;  %p866_p0 = pnand %p865_p13, %p859_p10 }
  0x40   :  { %v181_v31 = vsub.f32 %v179_v18, %v180_v24  ;;  %v188_v32 = vsub.f32 %v186_v19, %v187_v25  ;;  %v168_v35 = vand.u32 4294901760, %v167_v28  ;;  %v762_v43 = vpack.c.bf16 %v187_v25, %v180_v24 }
  0x41   :  { %v146_v33 = vsub.f32 %v144_v20, %v145_v26  ;;  %701 = vmatprep.mubr.f32.mxu0 %v145_v26  ;;  %v156_v34 = vsub.f32 %v154_v21, %v155_v27  ;;  %733 = vmatpush3.bf16.msra.mxu1 %v730_v16  ;;  %v175_v36 = vand.u32 4294901760, %v174_v29 }
  0x42   :  { %757 = vmatpush3.bf16.msra.mxu0 %v730_v16  ;;  %v182_v37 = vand.u32 4294901760, %v181_v31  ;;  %v189_v38 = vand.u32 4294901760, %v188_v32 }
  0x43   :  { %v147_v39 = vand.u32 4294901760, %v146_v33  ;;  %v157_v40 = vand.u32 4294901760, %v156_v34  ;;  %759 = vmatprep.subr.bf16.mxu0 %v758_v30  ;;  %v734_v41 = vpack.c.bf16 %v175_v36, %v168_v35 }
  0x44   :  { %v738_v42 = vpack.c.bf16 %v189_v38, %v182_v37 }
  0x45   :  { %668 = vmatprep.mubr.f32.mxu1 %v147_v39  ;;  %702 = vmatmul.mubr.f32.vlgmr.msra.gmra.mrb[0].mxu0 %v155_v27 }
  0x46   :  { %669 = vmatmul.mubr.f32.vlgmr.msra.gmra.mrb[0].mxu1 %v157_v40  ;;  %735 = vmatprep.subr.bf16.mxu1 %v734_v41 }
  0x47   :  { %737 = vmatpush3.bf16.msra.mxu1 %v734_v41  ;;  %761 = vmatpush3.bf16.msra.mxu0 %v758_v30 }
  0x48   :  { %739 = vmatprep.subr.bf16.mxu1 %v738_v42  ;;  %763 = vmatprep.subr.bf16.mxu0 %v762_v43 }
  0x49   :  { %679 = vmatprep.mubr.f32.mxu1 %v961_v13  ;;  %712 = vmatprep.mubr.f32.mxu0 %v961_v13 }
  0x4b   :  { %741 = vmatpush3.bf16.msra.mxu1 %v738_v42  ;;  %765 = vmatpush3.bf16.msra.mxu0 %v762_v43 }
  0x4c   :  { %743 = vmatprep.subr.bf16.mxu1 %v742_v44  ;;  %767 = vmatprep.subr.bf16.mxu0 %v726_v12 }
  0x4e   :  { %680 = vmatmul.mubr.f32.vlgmr.msra.gmra.mrb[0].mxu1 %v963_v14  ;;  %713 = vmatmul.mubr.f32.vlgmr.msra.gmra.mrb[0].mxu0 %v963_v14 }
  0x4f   :  { %745 = vmatpush3.bf16.msra.mxu1 %v742_v44  ;;  %769 = vmatpush3.bf16.msra.mxu0 %v726_v12 }
  0x50   :  { %747 = vmatprep.subr.bf16.mxu1 %v746_v45  ;;  %771 = vmatprep.subr.bf16.mxu0 %v730_v16 }
  0x51   :  { %690 = vmatprep.mubr.f32.mxu1 %v144_v20  ;;  %723 = vmatprep.mubr.f32.mxu0 %v961_v13 }
  0x53   :  { %749 = vmatpush3.bf16.msra.mxu1 %v746_v45  ;;  %773 = vmatpush3.bf16.msra.mxu0 %v730_v16 }
  0x56   :  { %691 = vmatmul.mubr.f32.vlgmr.msra.gmra.mrb[0].mxu1 %v154_v21  ;;  %724 = vmatmul.mubr.f32.vlgmr.msra.gmra.mrb[0].mxu0 %v963_v14 }
 0x129   :  { %v692_v47 = vpop.f32.mrb[0].mxu1  ;;  %v725_v48 = vpop.f32.mrb[0].mxu0 }
 0x12a   :  { %v774_v49 = vadd.f32 %v692_v47, %v623_v46  ;;  %v336_v50 = vpop.f32.mrb[1].mxu1  ;;  %v592_v51 = vpop.f32.mrb[1].mxu0 }
 0x12b   :  { %v776_v52 = vadd.f32 %v623_v46, %v336_v50 }
 0x12c   :  { %v775_v53 = vadd.f32 %v774_v49, %v725_v48 }
 0x12d   :  { %v777_v54 = vadd.f32 %v776_v52, %v592_v51 }
 0x12e   :  { %604 = vst.msk [vmem:[#allocation8 + $0x8] sm:$0xff] %vm602_vm1, %v775_v53 }
 0x12f   :  { %603 = vst.msk [vmem:[#allocation8] sm:$0xff] %vm602_vm1, %v777_v54 }
 0x130   :  { %869 = shalt.err (!%p866_p0)
}
 0x131   :  { %s870_s28 = scalar_lea.hbm %s991_s3, 256 }
 0x132   :  { %p871_p1 = scmp.ne.s32.totalorder %s991_s3, %s870_s28  ;;  %p874_p2 = scmp.lt.u32.totalorder %s870_s28, %s991_s3 }
 0x134   :  { %p876_p3 = pnand %p874_p2, %p871_p1 }
 0x136   :  { %879 = shalt.err (!%p876_p3)
}
 0x137   :  { %616 = dma.vmem_to_hbm [thread:$0]  %s611_s22, 256, %s991_s3, [#allocation4], %s888_s24, %s888_s24, %s889_s25  }
 0x138   :  { %884 = dma.done.wait [#allocation4], 256  }
 0x139   :  { %885 = vsyncadd [#allocation4], 4294967040 }
 0x13a   :  { %620 = vsyncpa [#allocation3], 1 }
 0x13b   :  { %621 = vsyncpa [#allocation6], 1 }
 0x13c   :  { %622 = vsyncpa [#allocation4], 1 }

</bundles_post_ra>
